<compile_context>
chip_gen: v7x
topology: tpu7x:2x2x1
jax: 0.10.0
libtpu: 0.0.40
codegen_flags: <defaults>
</compile_context>

<pallas_src>
import functools
import math

import numpy as np
import jax
import jax.numpy as jnp
from jax import lax
from jax.experimental import pallas as pl
from jax.experimental.pallas import tpu as pltpu


def _make_kernel(*, To, Ho, WoC):
    """Per-batch-element kernel: one fused banded conv matmul + spiking loop."""

    def kernel(x_ref, wb_ref, thr_ref, spk_ref, acc_ref):
        # ---- conv3d (stride 1, groups 1) as ONE banded matmul:
        # (To*Ho, Kp) x (Kp, Wo*Cout).  kt/kh/kw taps and Cin are all folded
        # into the contraction dim (im2col'ed LHS + banded weights built in
        # the wrapper), so the result lands directly in the lane-dense
        # (To*Ho, Wo*Cout) layout.  Drained straight into VMEM scratch so no
        # large value stays live across the spiking loop.
        acc_ref[...] = jnp.dot(x_ref[...], wb_ref[...],
                               preferred_element_type=jnp.float32)

        # ---- spiking dynamics: running membrane (cumsum over time),
        # pre-folded threshold, keep only the first spike per neuron.
        # All state is (Ho, Wo*Cout) lane-dense; every store is a full-width
        # unmasked vst at an 8-sublane-aligned offset.
        thr = jnp.broadcast_to(thr_ref[...], (Ho, WoC))   # hoisted broadcast
        mem = jnp.zeros((Ho, WoC), jnp.float32)
        alive = jnp.ones((Ho, WoC), jnp.float32)
        for t in range(To):                                # To = 8, static
            mem = mem + acc_ref[t * Ho:(t + 1) * Ho, :]
            spk_init = (mem > thr).astype(jnp.float32)     # spike_fn forward
            spk_t = alive * spk_init                       # first spike only
            alive = alive * (1.0 - spk_init)
            spk_ref[t * Ho:(t + 1) * Ho, :] = spk_t.astype(spk_ref.dtype)

    return kernel


def prepare_spiking_conv3d_params(w, b, *, kernel_size, dilation, input_hw,
                                  output_shape, eps=1e-8):
    """Precompute the banded weight matrix and lane-dense folded threshold.

    Depends only on (w, b) -> do this once per layer, not per forward call.
    Built in exact f32 numpy (no dot ops), so no precision surprises.
    """
    w_np = np.asarray(jax.device_get(w), dtype=np.float32)  # (Cout,Cin,kt,kh,kw)
    b_np = np.asarray(jax.device_get(b), dtype=np.float32)  # (Cout,)
    Cout, Cin, kt, kh, kw = w_np.shape
    assert (kt, kh, kw) == tuple(kernel_size)
    dt, dh, dw = dilation
    H, W = input_hw
    Ho, Wo = output_shape
    pt, ph, pw = (int(np.ceil((k - 1) * d / 2))
                  for k, d in zip(kernel_size, dilation))
    Wp = W + 2 * pw
    assert Wo + (kw - 1) * dw <= Wp
    WpC = Wp * Cin
    K = kt * kh * WpC
    Kp = ((K + 127) // 128) * 128
    WoC = Wo * Cout

    # Wb[(a*kh+bb)*WpC + wp*Cin + ci, wo*Cout + co] = w[co,ci,a,bb,c]
    #   iff wp == wo + c*dw  (zero otherwise; padded K rows are exact zeros)
    Wb6 = np.zeros((kt, kh, Wp, Cin, Wo, Cout), np.float32)
    for c in range(kw):
        w_c = np.transpose(w_np[:, :, :, :, c], (2, 3, 1, 0))  # (kt,kh,Cin,Cout)
        for wo in range(Wo):
            Wb6[:, :, wo + c * dw, :, wo, :] += w_c
    Wb = Wb6.reshape(K, WoC)
    Wb = np.pad(Wb, ((0, Kp - K), (0, 0)))

    # Pre-folded threshold: mem/(norm+eps) - b > 0  <=>  mem > b*(norm+eps)
    norm = np.sum(w_np.astype(np.float64) ** 2, axis=(1, 2, 3, 4))
    thr = np.tile((b_np * (norm + eps)).astype(np.float32), (Wo,))
    thr = thr.reshape(1, WoC)

    return jnp.asarray(Wb), jnp.asarray(thr)


@functools.partial(jax.jit,
                   static_argnames=("kernel_size", "dilation", "output_shape"))
def spiking_conv3d_fast(x, w_banded, thr, *, kernel_size, dilation,
                        output_shape):
    """x: (B, Cin, T, H, W) NCDHW; w_banded: (Kp, Wo*Cout); thr: (1, Wo*Cout)."""
    B, Cin, T, H, W = x.shape
    kt, kh, kw = kernel_size
    dt, dh, dw = dilation
    Ho, Wo = output_shape
    Kp, WoC = w_banded.shape
    Cout = WoC // Wo
    pt, ph, pw = (int(np.ceil((k - 1) * d / 2))
                  for k, d in zip(kernel_size, dilation))
    Tp, Hp, Wp = T + 2 * pt, H + 2 * ph, W + 2 * pw
    To = Tp - dt * (kt - 1)          # nb_steps (stride = 1)
    MH = To * Ho
    WpC = Wp * Cin
    K = kt * kh * WpC

    # Alignment assumptions (would silently degrade to masked stores /
    # relayouts for other output_shape / Cout values -> assert loudly).
    assert WoC % 128 == 0, "Wo*Cout must be a multiple of 128 (lane dim)"
    assert Ho % 8 == 0, "Ho must be a multiple of 8 (sublane dim)"
    assert Kp == ((K + 127) // 128) * 128, "banded weights built for other K"
    assert Ho <= Hp - dh * (kh - 1) and Wo <= Wp - dw * (kw - 1)

    # ---- glue (same jit as the kernel): pad + im2col of the kt*kh shifted
    # views into one lane-aligned (MH, Kp) LHS per batch element.  Doing the
    # (possibly unaligned) dh/dt shifts here removes the per-tap sublane
    # relayouts the kernel paid in v2.
    x_pad = jnp.pad(x, ((0, 0), (0, 0), (pt, pt), (ph, ph), (pw, pw)))
    x_l = jnp.transpose(x_pad, (0, 2, 3, 4, 1))        # (B, Tp, Hp, Wp, Cin)
    cols = []
    for a in range(kt):
        for bb in range(kh):
            v = x_l[:, a * dt:a * dt + To, bb * dh:bb * dh + Ho]
            cols.append(v.reshape(B, MH, WpC))
    x_lhs = jnp.concatenate(cols, axis=-1).astype(jnp.float32)  # (B, MH, K)
    x_lhs = jnp.pad(x_lhs, ((0, 0), (0, 0), (0, Kp - K)))        # zero K pad

    kernel = _make_kernel(To=To, Ho=Ho, WoC=WoC)

    # Per-step VMEM: double-buffered x (2x384K) + Wb (2x384K) + thr + out
    # (2x32K) + 64K scratch  ~= 1.7 MiB -> fine under the default scoped
    # limit on v5e/v6e/v7x; no vmem_limit_bytes override needed.
    # TODO(synk): for much larger T/H/W add an Ho grid axis, sized against
    # v7x's 64 MiB physical VMEM (not v5e/v6e's 128 MiB).
    spk_flat = pl.pallas_call(
        kernel,
        out_shape=jax.ShapeDtypeStruct((B, MH, WoC), jnp.bfloat16),
        grid_spec=pltpu.PrefetchScalarGridSpec(
            num_scalar_prefetch=0,
            grid=(B,),
            in_specs=[
                pl.BlockSpec((None, MH, Kp), lambda i: (i, 0, 0)),
                # constant index_map -> not re-DMA'd per grid step
                pl.BlockSpec((Kp, WoC), lambda i: (0, 0)),
                pl.BlockSpec((1, WoC), lambda i: (0, 0)),
            ],
            out_specs=pl.BlockSpec((None, MH, WoC), lambda i: (i, 0, 0)),
            scratch_shapes=[pltpu.VMEM((MH, WoC), jnp.float32)],
        ),
        # "parallel" so v7x can shard the batch over its two TensorCores.
        # TODO(synk): profile on v7x; if one TC idles, switch to
        # pltpu.CORE_PARALLEL / pl.core_map over a 2-core mesh.
        compiler_params=pltpu.CompilerParams(
            dimension_semantics=("parallel",)),
    )(x_lhs, w_banded, thr)

    # ---- glue: back to PyTorch NCDHW layout + the scalar regularizers.
    # Spikes are exactly 0/1, so the bf16 -> f32 cast and spk**2 == spk are
    # both lossless.
    spk5 = spk_flat.astype(jnp.float32).reshape(B, To, Ho, Wo, Cout)
    spk_rec = jnp.transpose(spk5, (0, 4, 1, 2, 3))       # (B, Cout, To, Ho, Wo)
    total = B * Cout * To * Ho * Wo
    loss = 0.5 * jnp.sum(spk5) / total                   # 'squared' (binary)
    tsum = jnp.sum(spk5, axis=(0, 2, 3, 4))              # per-timestep count
    spk_spread_loss = jnp.max(tsum) / (B * Cout * Ho * Wo)   # 'max'
    return spk_rec, (loss, spk_spread_loss)


def reference_forward(x, w, b, *, kernel_size, dilation, output_shape,
                      eps=1e-8):
    """Pure-JAX reference mirroring the PyTorch forward (full f32 precision)."""
    B = x.shape[0]
    Cout = w.shape[0]
    pad = tuple(int(np.ceil((k - 1) * d / 2))
                for k, d in zip(kernel_size, dilation))
    conv = lax.conv_general_dilated(
        x, w, window_strides=(1, 1, 1),
        padding=[(p, p) for p in pad],
        rhs_dilation=dilation,
        dimension_numbers=("NCDHW", "OIDHW", "NCDHW"),
        precision=lax.Precision.HIGHEST)
    conv = conv[:, :, :, :output_shape[0], :output_shape[1]]
    norm = jnp.sum(w ** 2, axis=(1, 2, 3, 4))
    mem = jnp.cumsum(conv, axis=2)
    mthr = (mem / (norm + eps)[None, :, None, None, None]
            - b[None, :, None, None, None])
    spk_init = (mthr > 0).astype(jnp.float32)
    cp = jnp.cumprod(1.0 - spk_init, axis=2)
    icci = 1.0 - cp
    rolled = jnp.roll(icci, 1, axis=2).at[:, :, 0].set(0.0)
    spk = icci - rolled
    loss = 0.5 * jnp.mean(spk ** 2)
    spread = (jnp.max(jnp.sum(spk, axis=(0, 1, 3, 4)))
              / (B * Cout * np.prod(output_shape)))
    return spk, loss, spread


if __name__ == "__main__":
    # small shapes consistent with the module
    B, Cin, T, H, W = 2, 4, 8, 16, 16
    Cout = 8
    kernel_size = (3, 3, 3)
    dilation = (1, 1, 1)
    output_shape = (16, 16)
    w_init_mean, w_init_std = 0.0, 1.0
    eps = 1e-8

    key = jax.random.PRNGKey(0)
    kx, kw_ = jax.random.split(key)
    x = jax.random.normal(kx, (B, Cin, T, H, W), dtype=jnp.float32)
    w_std = w_init_std * math.sqrt(1.0 / (Cin * float(np.prod(kernel_size))))
    w = (w_init_mean + w_std * jax.random.normal(
        kw_, (Cout, Cin) + kernel_size, dtype=jnp.float32))
    # b_init_method='constant' (then clamp(min=0)) -> deterministic constant
    b = jnp.full((Cout,), 1.0, dtype=jnp.float32)

    # weight prep done once (outside the per-call jitted wrapper)
    Wb, thr = prepare_spiking_conv3d_params(
        w, b, kernel_size=kernel_size, dilation=dilation,
        input_hw=(H, W), output_shape=output_shape, eps=eps)

    spk, (loss0_t, loss1_t) = spiking_conv3d_fast(
        x, Wb, thr, kernel_size=kernel_size, dilation=dilation,
        output_shape=output_shape)
    spk = jax.block_until_ready(spk)
    loss0 = float(loss0_t)
    loss1 = float(loss1_t)

    # correctness check vs pure-JAX reference (spikes are binary; allow a
    # vanishing fraction of threshold-boundary flips from conv accumulation
    # order differences)
    spk_r, loss_r, spread_r = reference_forward(
        x, w, b, kernel_size=kernel_size, dilation=dilation,
        output_shape=output_shape, eps=eps)
    assert spk.shape == spk_r.shape == (B, Cout, T, *output_shape)
    mismatch = float(jnp.mean(jnp.abs(spk - spk_r) > 1e-3))
    assert mismatch <= 1e-3, f"spike mismatch fraction {mismatch}"
    assert abs(loss0 - float(loss_r)) < 1e-3, (loss0, float(loss_r))
    assert abs(loss1 - float(spread_r)) < 1e-3, (loss1, float(spread_r))

    print("KERNEL_OK")
</pallas_src>

<mosaic_0001>
module attributes {stable_mosaic.version = 11 : i64} {
  func.func @kernel(%arg0: i32, %arg1: memref<1x128x768xf32, #tpu.memory_space<vmem>>, %arg2: memref<768x128xf32, #tpu.memory_space<vmem>>, %arg3: memref<1x128xf32, #tpu.memory_space<vmem>>, %arg4: memref<1x128x128xbf16, #tpu.memory_space<vmem>>, %arg5: memref<128x128xf32, #tpu.memory_space<vmem>>) attributes {dimension_semantics = [#tpu.dimension_semantics<parallel>], iteration_bounds = array<i64: 2>, scalar_prefetch = 0 : i64, scratch_operands = 1 : i64, tpu.core_type = #tpu.core_type<tc>, window_params = [{transform_indices = @transform_0, window_bounds = array<i64: 1, 128, 768>}, {pipeline_mode = #tpu.pipeline_mode<synchronous>, transform_indices = @transform_1, window_bounds = array<i64: 768, 128>}, {pipeline_mode = #tpu.pipeline_mode<synchronous>, transform_indices = @transform_2, window_bounds = array<i64: 1, 128>}, {transform_indices = @transform_3, window_bounds = array<i64: 1, 128, 128>}]} {
    %c0 = arith.constant 0 : index
    %c0_0 = arith.constant 0 : index
    %c0_1 = arith.constant 0 : index
    %0 = vector.load %arg1[%c0, %c0_0, %c0_1] : memref<1x128x768xf32, #tpu.memory_space<vmem>>, vector<1x128x768xf32>
    %1 = vector.shape_cast %0 : vector<1x128x768xf32> to vector<128x768xf32>
    %c0_2 = arith.constant 0 : index
    %c0_3 = arith.constant 0 : index
    %2 = vector.load %arg2[%c0_2, %c0_3] : memref<768x128xf32, #tpu.memory_space<vmem>>, vector<768x128xf32>
    %cst = arith.constant dense<0.000000e+00> : vector<128x128xf32>
    %3 = tpu.matmul %1, %2, %cst {dimension_numbers = #tpu.dot_dimension_numbers<[1], [0], [0], [1], [0, 0, 1, 1], [], []>} : vector<128x768xf32>, vector<768x128xf32>, vector<128x128xf32> -> vector<128x128xf32>
    %c0_4 = arith.constant 0 : index
    %c0_5 = arith.constant 0 : index
    %4 = vector.load %arg5[%c0_4, %c0_5] : memref<128x128xf32, #tpu.memory_space<vmem>>, vector<128x128xf32>
    tpu.vector_store %arg5[%c0_4, %c0_5], %3 {strides = array<i32>} : memref<128x128xf32, #tpu.memory_space<vmem>>, vector<128x128xf32>,
    %c0_6 = arith.constant 0 : index
    %c0_7 = arith.constant 0 : index
    %5 = vector.load %arg3[%c0_6, %c0_7] : memref<1x128xf32, #tpu.memory_space<vmem>>, vector<1x128xf32>
    %6 = vector.shape_cast %5 : vector<1x128xf32> to vector<1x128xf32>
    %7 = vector.broadcast %6 : vector<1x128xf32> to vector<16x128xf32>
    %cst_8 = arith.constant 0.000000e+00 : f32
    %8 = vector.broadcast %cst_8 : f32 to vector<16x128xf32>
    %cst_9 = arith.constant 1.000000e+00 : f32
    %9 = vector.broadcast %cst_9 : f32 to vector<16x128xf32>
    %c0_10 = arith.constant 0 : index
    %c0_11 = arith.constant 0 : index
    %10 = vector.load %arg5[%c0_10, %c0_11] : memref<128x128xf32, #tpu.memory_space<vmem>>, vector<16x128xf32>
    %11 = arith.addf %8, %10 : vector<16x128xf32>
    %12 = arith.cmpf ogt, %11, %7 : vector<16x128xf32>
    %13 = arith.extui %12 : vector<16x128xi1> to vector<16x128xi32>
    %14 = arith.sitofp %13 : vector<16x128xi32> to vector<16x128xf32>
    %15 = arith.mulf %9, %14 : vector<16x128xf32>
    %cst_12 = arith.constant 1.000000e+00 : f32
    %16 = vector.broadcast %cst_12 : f32 to vector<16x128xf32>
    %17 = arith.subf %16, %14 : vector<16x128xf32>
    %18 = arith.mulf %9, %17 : vector<16x128xf32>
    %19 = arith.truncf %15 : vector<16x128xf32> to vector<16x128xbf16>
    %c0_13 = arith.constant 0 : index
    %c0_14 = arith.constant 0 : index
    %c0_15 = arith.constant 0 : index
    %20 = vector.load %arg4[%c0_13, %c0_14, %c0_15] : memref<1x128x128xbf16, #tpu.memory_space<vmem>>, vector<1x16x128xbf16>
    %21 = vector.shape_cast %20 : vector<1x16x128xbf16> to vector<16x128xbf16>
    %22 = vector.shape_cast %19 : vector<16x128xbf16> to vector<1x16x128xbf16>
    tpu.vector_store %arg4[%c0_13, %c0_14, %c0_15], %22 {strides = array<i32>} : memref<1x128x128xbf16, #tpu.memory_space<vmem>>, vector<1x16x128xbf16>,
    %c16 = arith.constant 16 : index
    %c0_16 = arith.constant 0 : index
    %23 = vector.load %arg5[%c16, %c0_16] : memref<128x128xf32, #tpu.memory_space<vmem>>, vector<16x128xf32>
    %24 = arith.addf %11, %23 : vector<16x128xf32>
    %25 = arith.cmpf ogt, %24, %7 : vector<16x128xf32>
    %26 = arith.extui %25 : vector<16x128xi1> to vector<16x128xi32>
    %27 = arith.sitofp %26 : vector<16x128xi32> to vector<16x128xf32>
    %28 = arith.mulf %18, %27 : vector<16x128xf32>
    %cst_17 = arith.constant 1.000000e+00 : f32
    %29 = vector.broadcast %cst_17 : f32 to vector<16x128xf32>
    %30 = arith.subf %29, %27 : vector<16x128xf32>
    %31 = arith.mulf %18, %30 : vector<16x128xf32>
    %32 = arith.truncf %28 : vector<16x128xf32> to vector<16x128xbf16>
    %c0_18 = arith.constant 0 : index
    %c16_19 = arith.constant 16 : index
    %c0_20 = arith.constant 0 : index
    %33 = vector.load %arg4[%c0_18, %c16_19, %c0_20] : memref<1x128x128xbf16, #tpu.memory_space<vmem>>, vector<1x16x128xbf16>
    %34 = vector.shape_cast %33 : vector<1x16x128xbf16> to vector<16x128xbf16>
    %35 = vector.shape_cast %32 : vector<16x128xbf16> to vector<1x16x128xbf16>
    tpu.vector_store %arg4[%c0_18, %c16_19, %c0_20], %35 {strides = array<i32>} : memref<1x128x128xbf16, #tpu.memory_space<vmem>>, vector<1x16x128xbf16>,
    %c32 = arith.constant 32 : index
    %c0_21 = arith.constant 0 : index
    %36 = vector.load %arg5[%c32, %c0_21] : memref<128x128xf32, #tpu.memory_space<vmem>>, vector<16x128xf32>
    %37 = arith.addf %24, %36 : vector<16x128xf32>
    %38 = arith.cmpf ogt, %37, %7 : vector<16x128xf32>
    %39 = arith.extui %38 : vector<16x128xi1> to vector<16x128xi32>
    %40 = arith.sitofp %39 : vector<16x128xi32> to vector<16x128xf32>
    %41 = arith.mulf %31, %40 : vector<16x128xf32>
    %cst_22 = arith.constant 1.000000e+00 : f32
    %42 = vector.broadcast %cst_22 : f32 to vector<16x128xf32>
    %43 = arith.subf %42, %40 : vector<16x128xf32>
    %44 = arith.mulf %31, %43 : vector<16x128xf32>
    %45 = arith.truncf %41 : vector<16x128xf32> to vector<16x128xbf16>
    %c0_23 = arith.constant 0 : index
    %c32_24 = arith.constant 32 : index
    %c0_25 = arith.constant 0 : index
    %46 = vector.load %arg4[%c0_23, %c32_24, %c0_25] : memref<1x128x128xbf16, #tpu.memory_space<vmem>>, vector<1x16x128xbf16>
    %47 = vector.shape_cast %46 : vector<1x16x128xbf16> to vector<16x128xbf16>
    %48 = vector.shape_cast %45 : vector<16x128xbf16> to vector<1x16x128xbf16>
    tpu.vector_store %arg4[%c0_23, %c32_24, %c0_25], %48 {strides = array<i32>} : memref<1x128x128xbf16, #tpu.memory_space<vmem>>, vector<1x16x128xbf16>,
    %c48 = arith.constant 48 : index
    %c0_26 = arith.constant 0 : index
    %49 = vector.load %arg5[%c48, %c0_26] : memref<128x128xf32, #tpu.memory_space<vmem>>, vector<16x128xf32>
    %50 = arith.addf %37, %49 : vector<16x128xf32>
    %51 = arith.cmpf ogt, %50, %7 : vector<16x128xf32>
    %52 = arith.extui %51 : vector<16x128xi1> to vector<16x128xi32>
    %53 = arith.sitofp %52 : vector<16x128xi32> to vector<16x128xf32>
    %54 = arith.mulf %44, %53 : vector<16x128xf32>
    %cst_27 = arith.constant 1.000000e+00 : f32
    %55 = vector.broadcast %cst_27 : f32 to vector<16x128xf32>
    %56 = arith.subf %55, %53 : vector<16x128xf32>
    %57 = arith.mulf %44, %56 : vector<16x128xf32>
    %58 = arith.truncf %54 : vector<16x128xf32> to vector<16x128xbf16>
    %c0_28 = arith.constant 0 : index
    %c48_29 = arith.constant 48 : index
    %c0_30 = arith.constant 0 : index
    %59 = vector.load %arg4[%c0_28, %c48_29, %c0_30] : memref<1x128x128xbf16, #tpu.memory_space<vmem>>, vector<1x16x128xbf16>
    %60 = vector.shape_cast %59 : vector<1x16x128xbf16> to vector<16x128xbf16>
    %61 = vector.shape_cast %58 : vector<16x128xbf16> to vector<1x16x128xbf16>
    tpu.vector_store %arg4[%c0_28, %c48_29, %c0_30], %61 {strides = array<i32>} : memref<1x128x128xbf16, #tpu.memory_space<vmem>>, vector<1x16x128xbf16>,
    %c64 = arith.constant 64 : index
    %c0_31 = arith.constant 0 : index
    %62 = vector.load %arg5[%c64, %c0_31] : memref<128x128xf32, #tpu.memory_space<vmem>>, vector<16x128xf32>
    %63 = arith.addf %50, %62 : vector<16x128xf32>
    %64 = arith.cmpf ogt, %63, %7 : vector<16x128xf32>
    %65 = arith.extui %64 : vector<16x128xi1> to vector<16x128xi32>
    %66 = arith.sitofp %65 : vector<16x128xi32> to vector<16x128xf32>
    %67 = arith.mulf %57, %66 : vector<16x128xf32>
    %cst_32 = arith.constant 1.000000e+00 : f32
    %68 = vector.broadcast %cst_32 : f32 to vector<16x128xf32>
    %69 = arith.subf %68, %66 : vector<16x128xf32>
    %70 = arith.mulf %57, %69 : vector<16x128xf32>
    %71 = arith.truncf %67 : vector<16x128xf32> to vector<16x128xbf16>
    %c0_33 = arith.constant 0 : index
    %c64_34 = arith.constant 64 : index
    %c0_35 = arith.constant 0 : index
    %72 = vector.load %arg4[%c0_33, %c64_34, %c0_35] : memref<1x128x128xbf16, #tpu.memory_space<vmem>>, vector<1x16x128xbf16>
    %73 = vector.shape_cast %72 : vector<1x16x128xbf16> to vector<16x128xbf16>
    %74 = vector.shape_cast %71 : vector<16x128xbf16> to vector<1x16x128xbf16>
    tpu.vector_store %arg4[%c0_33, %c64_34, %c0_35], %74 {strides = array<i32>} : memref<1x128x128xbf16, #tpu.memory_space<vmem>>, vector<1x16x128xbf16>,
    %c80 = arith.constant 80 : index
    %c0_36 = arith.constant 0 : index
    %75 = vector.load %arg5[%c80, %c0_36] : memref<128x128xf32, #tpu.memory_space<vmem>>, vector<16x128xf32>
    %76 = arith.addf %63, %75 : vector<16x128xf32>
    %77 = arith.cmpf ogt, %76, %7 : vector<16x128xf32>
    %78 = arith.extui %77 : vector<16x128xi1> to vector<16x128xi32>
    %79 = arith.sitofp %78 : vector<16x128xi32> to vector<16x128xf32>
    %80 = arith.mulf %70, %79 : vector<16x128xf32>
    %cst_37 = arith.constant 1.000000e+00 : f32
    %81 = vector.broadcast %cst_37 : f32 to vector<16x128xf32>
    %82 = arith.subf %81, %79 : vector<16x128xf32>
    %83 = arith.mulf %70, %82 : vector<16x128xf32>
    %84 = arith.truncf %80 : vector<16x128xf32> to vector<16x128xbf16>
    %c0_38 = arith.constant 0 : index
    %c80_39 = arith.constant 80 : index
    %c0_40 = arith.constant 0 : index
    %85 = vector.load %arg4[%c0_38, %c80_39, %c0_40] : memref<1x128x128xbf16, #tpu.memory_space<vmem>>, vector<1x16x128xbf16>
    %86 = vector.shape_cast %85 : vector<1x16x128xbf16> to vector<16x128xbf16>
    %87 = vector.shape_cast %84 : vector<16x128xbf16> to vector<1x16x128xbf16>
    tpu.vector_store %arg4[%c0_38, %c80_39, %c0_40], %87 {strides = array<i32>} : memref<1x128x128xbf16, #tpu.memory_space<vmem>>, vector<1x16x128xbf16>,
    %c96 = arith.constant 96 : index
    %c0_41 = arith.constant 0 : index
    %88 = vector.load %arg5[%c96, %c0_41] : memref<128x128xf32, #tpu.memory_space<vmem>>, vector<16x128xf32>
    %89 = arith.addf %76, %88 : vector<16x128xf32>
    %90 = arith.cmpf ogt, %89, %7 : vector<16x128xf32>
    %91 = arith.extui %90 : vector<16x128xi1> to vector<16x128xi32>
    %92 = arith.sitofp %91 : vector<16x128xi32> to vector<16x128xf32>
    %93 = arith.mulf %83, %92 : vector<16x128xf32>
    %cst_42 = arith.constant 1.000000e+00 : f32
    %94 = vector.broadcast %cst_42 : f32 to vector<16x128xf32>
    %95 = arith.subf %94, %92 : vector<16x128xf32>
    %96 = arith.mulf %83, %95 : vector<16x128xf32>
    %97 = arith.truncf %93 : vector<16x128xf32> to vector<16x128xbf16>
    %c0_43 = arith.constant 0 : index
    %c96_44 = arith.constant 96 : index
    %c0_45 = arith.constant 0 : index
    %98 = vector.load %arg4[%c0_43, %c96_44, %c0_45] : memref<1x128x128xbf16, #tpu.memory_space<vmem>>, vector<1x16x128xbf16>
    %99 = vector.shape_cast %98 : vector<1x16x128xbf16> to vector<16x128xbf16>
    %100 = vector.shape_cast %97 : vector<16x128xbf16> to vector<1x16x128xbf16>
    tpu.vector_store %arg4[%c0_43, %c96_44, %c0_45], %100 {strides = array<i32>} : memref<1x128x128xbf16, #tpu.memory_space<vmem>>, vector<1x16x128xbf16>,
    %c112 = arith.constant 112 : index
    %c0_46 = arith.constant 0 : index
    %101 = vector.load %arg5[%c112, %c0_46] : memref<128x128xf32, #tpu.memory_space<vmem>>, vector<16x128xf32>
    %102 = arith.addf %89, %101 : vector<16x128xf32>
    %103 = arith.cmpf ogt, %102, %7 : vector<16x128xf32>
    %104 = arith.extui %103 : vector<16x128xi1> to vector<16x128xi32>
    %105 = arith.sitofp %104 : vector<16x128xi32> to vector<16x128xf32>
    %106 = arith.mulf %96, %105 : vector<16x128xf32>
    %107 = arith.truncf %106 : vector<16x128xf32> to vector<16x128xbf16>
    %c0_47 = arith.constant 0 : index
    %c112_48 = arith.constant 112 : index
    %c0_49 = arith.constant 0 : index
    %108 = vector.load %arg4[%c0_47, %c112_48, %c0_49] : memref<1x128x128xbf16, #tpu.memory_space<vmem>>, vector<1x16x128xbf16>
    %109 = vector.shape_cast %108 : vector<1x16x128xbf16> to vector<16x128xbf16>
    %110 = vector.shape_cast %107 : vector<16x128xbf16> to vector<1x16x128xbf16>
    tpu.vector_store %arg4[%c0_47, %c112_48, %c0_49], %110 {strides = array<i32>} : memref<1x128x128xbf16, #tpu.memory_space<vmem>>, vector<1x16x128xbf16>,
    return
  }
  func.func @transform_0(%arg0: i32) -> (i32, i32, i32) {
    %c0_i32 = arith.constant 0 : i32
    %c0_i32_0 = arith.constant 0 : i32
    %c0_i32_1 = arith.constant 0 : i32
    return %arg0, %c0_i32, %c0_i32_0 : i32, i32, i32
  }
  func.func @transform_1(%arg0: i32) -> (i32, i32) {
    %c0_i32 = arith.constant 0 : i32
    %c0_i32_0 = arith.constant 0 : i32
    %c0_i32_1 = arith.constant 0 : i32
    return %c0_i32, %c0_i32_0 : i32, i32
  }
  func.func @transform_2(%arg0: i32) -> (i32, i32) {
    %c0_i32 = arith.constant 0 : i32
    %c0_i32_0 = arith.constant 0 : i32
    %c0_i32_1 = arith.constant 0 : i32
    return %c0_i32, %c0_i32_0 : i32, i32
  }
  func.func @transform_3(%arg0: i32) -> (i32, i32, i32) {
    %c0_i32 = arith.constant 0 : i32
    %c0_i32_0 = arith.constant 0 : i32
    %c0_i32_1 = arith.constant 0 : i32
    return %arg0, %c0_i32, %c0_i32_0 : i32, i32, i32
  }
}

</mosaic_0001>

<bundles_post_ra>
// kernel: spiking_conv3d_fast.1
= control target key start
LH: loop header
LB: loop body
LE: loop exit
PB: predicated region body
PF: predicated region fallthrough
CT: control target
= control target key end

     0   :  { %s1572_s12 = smov 0   ;;  %s2065_s0 = inlined_call_operand.vmem [shape: f32[2,128,768], index: 0, kind: input, shape index: {}]   ;;  %s2066_s1 = inlined_call_operand.vmem [shape: f32[768,128], index: 1, kind: input, shape index: {}]   ;;  %s2067_s2 = inlined_call_operand.vmem [shape: f32[1,128], index: 2, kind: input, shape index: {}]   ;;  %s2068_s3 = inlined_call_operand.vmem [shape: bf16[2,128,128], index: 3, kind: output, shape index: {}]  }
   0x1 LB: > { %s1076_s13 = sadd.s32 4294967295, %s1549_s12   ;;  %p1080_p0 = scmp.ge.s32.totalorder %s1549_s12, 1  ;;  %s1549_s12 = sphi %s1572_s12, %s13_s12  }
   0x2   : > { %p137_p1 = scmp.lt.s32.totalorder %s1549_s12, 3 }
   0x4   : > { %p138_p2 = pnand %p1080_p0, %p137_p1 }
   0x5   : > { %v283_v0 = vld [vmem:[%s2066_s1 + $0x80] sm:$0xff] (!%p138_p2)  ;;  %v284_v1 = vld [vmem:[%s2066_s1 + $0x88] sm:$0xff] (!%p138_p2)  ;;  %p161_p3 = scmp.lt.s32.totalorder (!%p138_p2), %s1076_s13, 1  ;;  %v285_v5 = vld [vmem:[%s2066_s1 + $0x90] sm:$0xff] (!%p138_p2) }
   0x6   : > { %141 = sbr.rel (%p138_p2) target bundleno = 360 (0x168), region = 32  ;;  %v267_v2 = vld [vmem:[%s2066_s1] sm:$0xff] (!%p138_p2)  ;;  %v1421_v3 = vpack.c.bf16 (!%p138_p2), %v284_v1, %v283_v0  ;;  %v268_v4 = vld [vmem:[%s2066_s1 + $0x8] sm:$0xff] (!%p138_p2)  ;;  %v286_v6 = vld [vmem:[%s2066_s1 + $0x98] sm:$0xff] (!%p138_p2) }
   0x7   : > { %v1423_v7 = vpack.c.bf16 (!%p138_p2), %v268_v4, %v267_v2  ;;  %v1425_v8 = vpack.c.bf16 (!%p138_p2), %v286_v6, %v285_v5  ;;  %v269_v9 = vld [vmem:[%s2066_s1 + $0x10] sm:$0xff] (!%p138_p2)  ;;  %v270_v10 = vld [vmem:[%s2066_s1 + $0x18] sm:$0xff] (!%p138_p2)  ;;  %v287_v11 = vld [vmem:[%s2066_s1 + $0xa0] sm:$0xff] (!%p138_p2) }
   0x8   : > { %1517 = vmatprep.subr.bf16.mxu1 (!%p138_p2), %v1421_v3  ;;  %1422 = vmatprep.subr.bf16.mxu0 (!%p138_p2), %v1421_v3  ;;  %v288_v12 = vld [vmem:[%s2066_s1 + $0xa8] sm:$0xff] (!%p138_p2)  ;;  %v1427_v13 = vpack.c.bf16 (!%p138_p2), %v270_v10, %v269_v9  ;;  %v271_v15 = vld [vmem:[%s2066_s1 + $0x20] sm:$0xff] (!%p138_p2)  ;;  %v289_v17 = vld [vmem:[%s2066_s1 + $0xb0] sm:$0xff] (!%p138_p2) }
   0x9   : > { %1525 = vmatpush3.bf16.msra.mxu1 (!%p138_p2), %v1423_v7  ;;  %1424 = vmatpush3.bf16.msra.mxu0 (!%p138_p2), %v1423_v7  ;;  %v1429_v14 = vpack.c.bf16 (!%p138_p2), %v288_v12, %v287_v11  ;;  %v272_v16 = vld [vmem:[%s2066_s1 + $0x28] sm:$0xff] (!%p138_p2)  ;;  %v290_v18 = vld [vmem:[%s2066_s1 + $0xb8] sm:$0xff] (!%p138_p2)  ;;  %v273_v21 = vld [vmem:[%s2066_s1 + $0x30] sm:$0xff] (!%p138_p2) }
   0xa   : > { %1518 = vmatprep.subr.bf16.mxu1 (!%p138_p2), %v1425_v8  ;;  %1426 = vmatprep.subr.bf16.mxu0 (!%p138_p2), %v1425_v8  ;;  %v1431_v19 = vpack.c.bf16 (!%p138_p2), %v272_v16, %v271_v15  ;;  %v1433_v20 = vpack.c.bf16 (!%p138_p2), %v290_v18, %v289_v17  ;;  %v274_v22 = vld [vmem:[%s2066_s1 + $0x38] sm:$0xff] (!%p138_p2)  ;;  %v291_v23 = vld [vmem:[%s2066_s1 + $0xc0] sm:$0xff] (!%p138_p2)  ;;  %v292_v24 = vld [vmem:[%s2066_s1 + $0xc8] sm:$0xff] (!%p138_p2) }
   0xb   : > { %v1435_v26 = vpack.c.bf16 (!%p138_p2), %v274_v22, %v273_v21  ;;  %v1437_v28 = vpack.c.bf16 (!%p138_p2), %v292_v24, %v291_v23  ;;  %v275_v29 = vld [vmem:[%s2066_s1 + $0x40] sm:$0xff] (!%p138_p2)  ;;  %v276_v30 = vld [vmem:[%s2066_s1 + $0x48] sm:$0xff] (!%p138_p2)  ;;  %v293_v31 = vld [vmem:[%s2066_s1 + $0xd0] sm:$0xff] (!%p138_p2) }
   0xc   : > { %v294_v32 = vld [vmem:[%s2066_s1 + $0xd8] sm:$0xff] (!%p138_p2)  ;;  %v1439_v33 = vpack.c.bf16 (!%p138_p2), %v276_v30, %v275_v29  ;;  %v277_v35 = vld [vmem:[%s2066_s1 + $0x50] sm:$0xff] (!%p138_p2)  ;;  %v295_v37 = vld [vmem:[%s2066_s1 + $0xe0] sm:$0xff] (!%p138_p2) }
   0xd   : > { %s2070_s13 = smov (!%p161_p3, %s1076_s13), 1  ;;  %1526 = vmatpush3.bf16.msra.mxu1 %v1427_v13  ;;  %1428 = vmatpush3.bf16.msra.mxu0 %v1427_v13  ;;  %v1441_v34 = vpack.c.bf16 %v294_v32, %v293_v31  ;;  %v278_v36 = vld [vmem:[%s2066_s1 + $0x58] sm:$0xff]  ;;  %v296_v38 = vld [vmem:[%s2066_s1 + $0xe8] sm:$0xff]  ;;  %v279_v41 = vld [vmem:[%s2066_s1 + $0x60] sm:$0xff] }
   0xe   : > { %s1533_s7 = smul.u32 768, %s2070_s13  ;;  %1519 = vmatprep.subr.bf16.mxu1 %v1429_v14  ;;  %1430 = vmatprep.subr.bf16.mxu0 %v1429_v14  ;;  %v1443_v39 = vpack.c.bf16 %v278_v36, %v277_v35  ;;  %v1445_v40 = vpack.c.bf16 %v296_v38, %v295_v37  ;;  %v280_v42 = vld [vmem:[%s2066_s1 + $0x68] sm:$0xff]  ;;  %v297_v43 = vld [vmem:[%s2066_s1 + $0xf0] sm:$0xff]  ;;  %v298_v44 = vld [vmem:[%s2066_s1 + $0xf8] sm:$0xff]  ;;  %s1119_s17 = sshll.u32 %s2070_s13, 6 }
   0xf   : > { %v1447_v45 = vpack.c.bf16 %v280_v42, %v279_v41  ;;  %v1449_v46 = vpack.c.bf16 %v298_v44, %v297_v43  ;;  %v281_v47 = vld [vmem:[%s2066_s1 + $0x70] sm:$0xff]  ;;  %v282_v48 = vld [vmem:[%s2066_s1 + $0x78] sm:$0xff]  ;;  %v315_v49 = vld [vmem:[%s2066_s1 + $0x180] sm:$0xff]  ;;  %s2010_s21 = scalar_lea.vmem %s2068_s3, %s1119_s17 }
  0x10   : > { %s1628_s20 = scalar_lea.vmem %s2065_s0, %s1533_s7  ;;  %v316_v50 = vld [vmem:[%s2066_s1 + $0x188] sm:$0xff]  ;;  %v347_v51 = vld [vmem:[%s2066_s1 + $0x280] sm:$0xff]  ;;  %v1451_v53 = vpack.c.bf16 %v282_v48, %v281_v47  ;;  %v317_v60 = vld [vmem:[%s2066_s1 + $0x190] sm:$0xff] }
  0x11   : > { %v220_v25 = vld [vmem:[%s1628_s20 + $0x188] sm:$0xff]  ;;  %1527 = vmatpush3.bf16.msra.mxu1 %v1431_v19  ;;  %1432 = vmatpush3.bf16.msra.mxu0 %v1431_v19  ;;  %v1453_v54 = vpack.c.bf16 %v316_v50, %v315_v49  ;;  %v299_v55 = vld [vmem:[%s2066_s1 + $0x100] sm:$0xff]  ;;  %v318_v61 = vld [vmem:[%s2066_s1 + $0x198] sm:$0xff] }
  0x12   : > { %467 = vmatprep.mubr.f32.mxu1 %v220_v25  ;;  %v172_v27 = vld [vmem:[%s1628_s20 + $0x8] sm:$0xff]  ;;  %1520 = vmatprep.subr.bf16.mxu1 %v1433_v20  ;;  %v331_v58 = vld [vmem:[%s2066_s1 + $0x200] sm:$0xff]  ;;  %v349_v62 = vld [vmem:[%s2066_s1 + $0x290] sm:$0xff]  ;;  %v1457_v5 = vpack.c.bf16 %v318_v61, %v317_v60 }
  0x13   : > { %1434 = vmatprep.subr.bf16.mxu0 %v1433_v20  ;;  %427 = vmatprep.mubr.f32.mxu0 %v172_v27  ;;  %v348_v52 = vld [vmem:[%s2066_s1 + $0x288] sm:$0xff]  ;;  %v350_v63 = vld [vmem:[%s2066_s1 + $0x298] sm:$0xff]  ;;  %v219_v0 = vld [vmem:[%s1628_s20 + $0x180] sm:$0xff] }
  0x14   : > { %v300_v56 = vld [vmem:[%s2066_s1 + $0x108] sm:$0xff]  ;;  %v1485_v57 = vpack.c.bf16 %v348_v52, %v347_v51  ;;  %v171_v2 = vld [vmem:[%s1628_s20] sm:$0xff]  ;;  %v226_v3 = vld [vmem:[%s1628_s20 + $0x1b8] sm:$0xff]  ;;  %v1489_v9 = vpack.c.bf16 %v350_v63, %v349_v62 }
  0x15   : > { %1528 = vmatpush3.bf16.msra.mxu1 %v1435_v26  ;;  %1436 = vmatpush3.bf16.msra.mxu0 %v1435_v26  ;;  %v332_v59 = vld [vmem:[%s2066_s1 + $0x208] sm:$0xff]  ;;  %v1455_v1 = vpack.c.bf16 %v300_v56, %v299_v55  ;;  %v301_v6 = vld [vmem:[%s2066_s1 + $0x110] sm:$0xff]  ;;  %v302_v7 = vld [vmem:[%s2066_s1 + $0x118] sm:$0xff] }
  0x16   : > { %1521 = vmatprep.subr.bf16.mxu1 %v1437_v28  ;;  %1438 = vmatprep.subr.bf16.mxu0 %v1437_v28  ;;  %v1487_v4 = vpack.c.bf16 %v332_v59, %v331_v58  ;;  %v333_v8 = vld [vmem:[%s2066_s1 + $0x210] sm:$0xff]  ;;  %v334_v10 = vld [vmem:[%s2066_s1 + $0x218] sm:$0xff]  ;;  %v319_v11 = vld [vmem:[%s2066_s1 + $0x1a0] sm:$0xff]  ;;  %v1459_v17 = vpack.c.bf16 %v302_v7, %v301_v6 }
  0x17   : > { %v320_v12 = vld [vmem:[%s2066_s1 + $0x1a8] sm:$0xff]  ;;  %v178_v13 = vld [vmem:[%s1628_s20 + $0x38] sm:$0xff]  ;;  %v351_v14 = vld [vmem:[%s2066_s1 + $0x2a0] sm:$0xff]  ;;  %v1491_v20 = vpack.c.bf16 %v334_v10, %v333_v8 }
  0x18   : > { %v352_v15 = vld [vmem:[%s2066_s1 + $0x2a8] sm:$0xff]  ;;  %v225_v16 = vld [vmem:[%s1628_s20 + $0x1b0] sm:$0xff]  ;;  %v1461_v21 = vpack.c.bf16 %v320_v12, %v319_v11  ;;  %v303_v22 = vld [vmem:[%s2066_s1 + $0x120] sm:$0xff] }
  0x19   : > { %1529 = vmatpush3.bf16.msra.mxu1 %v1439_v33  ;;  %1440 = vmatpush3.bf16.msra.mxu0 %v1439_v33  ;;  %v177_v18 = vld [vmem:[%s1628_s20 + $0x30] sm:$0xff]  ;;  %v232_v19 = vld [vmem:[%s1628_s20 + $0x1e8] sm:$0xff]  ;;  %v335_v24 = vld [vmem:[%s2066_s1 + $0x220] sm:$0xff]  ;;  %v1493_v25 = vpack.c.bf16 %v352_v15, %v351_v14 }
  0x1a   : > { %1522 = vmatprep.subr.bf16.mxu1 %v1441_v34  ;;  %1442 = vmatprep.subr.bf16.mxu0 %v1441_v34  ;;  %v304_v23 = vld [vmem:[%s2066_s1 + $0x128] sm:$0xff]  ;;  %v321_v27 = vld [vmem:[%s2066_s1 + $0x1b0] sm:$0xff]  ;;  %v322_v28 = vld [vmem:[%s2066_s1 + $0x1b8] sm:$0xff] }
  0x1b   : > { %v336_v26 = vld [vmem:[%s2066_s1 + $0x228] sm:$0xff]  ;;  %v353_v30 = vld [vmem:[%s2066_s1 + $0x2b0] sm:$0xff]  ;;  %v354_v31 = vld [vmem:[%s2066_s1 + $0x2b8] sm:$0xff]  ;;  %v1463_v33 = vpack.c.bf16 %v304_v23, %v303_v22  ;;  %v1465_v37 = vpack.c.bf16 %v322_v28, %v321_v27 }
  0x1c   : > { %v184_v29 = vld [vmem:[%s1628_s20 + $0x68] sm:$0xff]  ;;  %v231_v32 = vld [vmem:[%s1628_s20 + $0x1e0] sm:$0xff]  ;;  %v238_v35 = vld [vmem:[%s1628_s20 + $0x218] sm:$0xff]  ;;  %v1495_v36 = vpack.c.bf16 %v336_v26, %v335_v24  ;;  %v1497_v41 = vpack.c.bf16 %v354_v31, %v353_v30 }
  0x1d   : > { %1530 = vmatpush3.bf16.msra.mxu1 %v1443_v39  ;;  %1444 = vmatpush3.bf16.msra.mxu0 %v1443_v39  ;;  %v183_v34 = vld [vmem:[%s1628_s20 + $0x60] sm:$0xff]  ;;  %v305_v38 = vld [vmem:[%s2066_s1 + $0x130] sm:$0xff]  ;;  %v306_v39 = vld [vmem:[%s2066_s1 + $0x138] sm:$0xff] }
  0x1e   : > { %1523 = vmatprep.subr.bf16.mxu1 %v1445_v40  ;;  %1446 = vmatprep.subr.bf16.mxu0 %v1445_v40  ;;  %v337_v40 = vld [vmem:[%s2066_s1 + $0x230] sm:$0xff]  ;;  %v338_v42 = vld [vmem:[%s2066_s1 + $0x238] sm:$0xff]  ;;  %v323_v43 = vld [vmem:[%s2066_s1 + $0x1c0] sm:$0xff]  ;;  %v1467_v49 = vpack.c.bf16 %v306_v39, %v305_v38 }
  0x1f   : > { %v324_v44 = vld [vmem:[%s2066_s1 + $0x1c8] sm:$0xff]  ;;  %v237_v48 = vld [vmem:[%s1628_s20 + $0x210] sm:$0xff]  ;;  %v1499_v52 = vpack.c.bf16 %v338_v42, %v337_v40  ;;  %v339_v56 = vld [vmem:[%s2066_s1 + $0x240] sm:$0xff] }
  0x20   : > { %v356_v47 = vld [vmem:[%s2066_s1 + $0x2c8] sm:$0xff]  ;;  %v189_v50 = vld [vmem:[%s1628_s20 + $0x90] sm:$0xff]  ;;  %v326_v60 = vld [vmem:[%s2066_s1 + $0x1d8] sm:$0xff] }
  0x21   : > { %1531 = vmatpush3.bf16.msra.mxu1 %v1447_v45  ;;  %1448 = vmatpush3.bf16.msra.mxu0 %v1447_v45  ;;  %v190_v45 = vld [vmem:[%s1628_s20 + $0x98] sm:$0xff]  ;;  %v244_v51 = vld [vmem:[%s1628_s20 + $0x248] sm:$0xff]  ;;  %v325_v59 = vld [vmem:[%s2066_s1 + $0x1d0] sm:$0xff] }
  0x22   : > { %1524 = vmatprep.subr.bf16.mxu1 %v1449_v46  ;;  %1450 = vmatprep.subr.bf16.mxu0 %v1449_v46  ;;  %v355_v46 = vld [vmem:[%s2066_s1 + $0x2c0] sm:$0xff]  ;;  %v308_v55 = vld [vmem:[%s2066_s1 + $0x148] sm:$0xff]  ;;  %v357_v62 = vld [vmem:[%s2066_s1 + $0x2d0] sm:$0xff] }
  0x23   : > { %v340_v58 = vld [vmem:[%s2066_s1 + $0x248] sm:$0xff]  ;;  %v358_v63 = vld [vmem:[%s2066_s1 + $0x2d8] sm:$0xff]  ;;  %v309_v6 = vld [vmem:[%s2066_s1 + $0x150] sm:$0xff] }
  0x24   : > { %v196_v61 = vld [vmem:[%s1628_s20 + $0xc8] sm:$0xff]  ;;  %v310_v7 = vld [vmem:[%s2066_s1 + $0x158] sm:$0xff]  ;;  %v341_v8 = vld [vmem:[%s2066_s1 + $0x250] sm:$0xff] }
  0x25   : > { %1532 = vmatpush3.bf16.msra.mxu1 %v1451_v53  ;;  %1452 = vmatpush3.bf16.msra.mxu0 %v1451_v53  ;;  %v1469_v53 = vpack.c.bf16 %v324_v44, %v323_v43  ;;  %v342_v10 = vld [vmem:[%s2066_s1 + $0x258] sm:$0xff]  ;;  %v327_v11 = vld [vmem:[%s2066_s1 + $0x1e0] sm:$0xff]  ;;  %v328_v12 = vld [vmem:[%s2066_s1 + $0x1e8] sm:$0xff] }
  0x26   : > { %1454 = vmatprep.subr.bf16.mxu1 %v1453_v54  ;;  %1486 = vmatprep.subr.bf16.mxu0 %v1485_v57  ;;  %v307_v54 = vld [vmem:[%s2066_s1 + $0x140] sm:$0xff]  ;;  %v1501_v57 = vpack.c.bf16 %v356_v47, %v355_v46  ;;  %v360_v15 = vld [vmem:[%s2066_s1 + $0x2e8] sm:$0xff]  ;;  %v329_v27 = vld [vmem:[%s2066_s1 + $0x1f0] sm:$0xff] }
  0x27   : > { %v359_v14 = vld [vmem:[%s2066_s1 + $0x2e0] sm:$0xff]  ;;  %v312_v23 = vld [vmem:[%s2066_s1 + $0x168] sm:$0xff]  ;;  %v330_v28 = vld [vmem:[%s2066_s1 + $0x1f8] sm:$0xff] }
  0x28   : > { %468 = vmatmul.mubr.f32.vlgmr.msra.gmra.mrb[0].mxu1 %v219_v0  ;;  %428 = vmatmul.mubr.f32.vlgmr.msra.gmra.mrb[0].mxu0 %v171_v2  ;;  %v243_v0 = vld [vmem:[%s1628_s20 + $0x240] sm:$0xff]  ;;  %v344_v26 = vld [vmem:[%s2066_s1 + $0x268] sm:$0xff]  ;;  %v361_v30 = vld [vmem:[%s2066_s1 + $0x2f0] sm:$0xff] }
  0x29   : > { %1456 = vmatpush3.bf16.msra.mxu1 %v1455_v1  ;;  %472 = vmatprep.mubr.f32.mxu1 %v226_v3  ;;  %v1471_v1 = vpack.c.bf16 %v308_v55, %v307_v54  ;;  %v195_v2 = vld [vmem:[%s1628_s20 + $0xc0] sm:$0xff]  ;;  %v250_v3 = vld [vmem:[%s1628_s20 + $0x278] sm:$0xff]  ;;  %v313_v38 = vld [vmem:[%s2066_s1 + $0x170] sm:$0xff] }
  0x2a   : > { %1488 = vmatpush3.bf16.msra.mxu0 %v1487_v4  ;;  %1458 = vmatprep.subr.bf16.mxu1 %v1457_v5  ;;  %v1503_v4 = vpack.c.bf16 %v340_v58, %v339_v56  ;;  %v1473_v5 = vpack.c.bf16 %v326_v60, %v325_v59  ;;  %v311_v22 = vld [vmem:[%s2066_s1 + $0x160] sm:$0xff]  ;;  %v362_v31 = vld [vmem:[%s2066_s1 + $0x2f8] sm:$0xff]  ;;  %v261_v44 = vld [vmem:[%s1628_s20 + $0x2d0] sm:$0xff] }
  0x2b   : > { %432 = vmatprep.mubr.f32.mxu0 %v178_v13  ;;  %1490 = vmatprep.subr.bf16.mxu0 %v1489_v9  ;;  %v1505_v9 = vpack.c.bf16 %v358_v63, %v357_v62  ;;  %v202_v13 = vld [vmem:[%s1628_s20 + $0xf8] sm:$0xff]  ;;  %v343_v24 = vld [vmem:[%s2066_s1 + $0x260] sm:$0xff]  ;;  %v1513_v40 = vpack.c.bf16 %v362_v31, %v361_v30  ;;  %v213_v46 = vld [vmem:[%s1628_s20 + $0x150] sm:$0xff] }
  0x2c   : > { %473 = vmatmul.mubr.f32.gmra.mrb[2].mxu1 %v225_v16  ;;  %433 = vmatmul.mubr.f32.gmra.mrb[2].mxu0 %v177_v18  ;;  %v249_v16 = vld [vmem:[%s1628_s20 + $0x270] sm:$0xff]  ;;  %v314_v39 = vld [vmem:[%s2066_s1 + $0x178] sm:$0xff]  ;;  %v179_v54 = vld [vmem:[%s1628_s20 + $0x40] sm:$0xff] }
  0x2d   : > { %1460 = vmatpush3.bf16.msra.mxu1 %v1459_v17  ;;  %477 = vmatprep.mubr.f32.mxu1 %v232_v19  ;;  %v1475_v17 = vpack.c.bf16 %v310_v7, %v309_v6  ;;  %v201_v18 = vld [vmem:[%s1628_s20 + $0xf0] sm:$0xff]  ;;  %v256_v19 = vld [vmem:[%s1628_s20 + $0x2a8] sm:$0xff]  ;;  %v346_v42 = vld [vmem:[%s2066_s1 + $0x278] sm:$0xff] }
  0x2e   : > { %1492 = vmatpush3.bf16.msra.mxu0 %v1491_v20  ;;  %1462 = vmatprep.subr.bf16.mxu1 %v1461_v21  ;;  %v1507_v20 = vpack.c.bf16 %v342_v10, %v341_v8  ;;  %v1477_v21 = vpack.c.bf16 %v328_v12, %v327_v11  ;;  %v214_v43 = vld [vmem:[%s1628_s20 + $0x158] sm:$0xff]  ;;  %v181_v55 = vld [vmem:[%s1628_s20 + $0x50] sm:$0xff]  ;;  %v187_v59 = vld [vmem:[%s1628_s20 + $0x80] sm:$0xff] }
  0x2f   : > { %437 = vmatprep.mubr.f32.mxu0 %v184_v29  ;;  %1494 = vmatprep.subr.bf16.mxu0 %v1493_v25  ;;  %v1509_v25 = vpack.c.bf16 %v360_v15, %v359_v14  ;;  %v208_v29 = vld [vmem:[%s1628_s20 + $0x128] sm:$0xff]  ;;  %v174_v47 = vld [vmem:[%s1628_s20 + $0x18] sm:$0xff]  ;;  %v185_v58 = vld [vmem:[%s1628_s20 + $0x70] sm:$0xff] }
  0x30   : > { %478 = vmatmul.mubr.f32.gmra.mrb[4].mxu1 %v231_v32  ;;  %438 = vmatmul.mubr.f32.gmra.mrb[4].mxu0 %v183_v34  ;;  %v255_v32 = vld [vmem:[%s1628_s20 + $0x2a0] sm:$0xff]  ;;  %v186_v56 = vld [vmem:[%s1628_s20 + $0x78] sm:$0xff]  ;;  %v192_v60 = vld [vmem:[%s1628_s20 + $0xa8] sm:$0xff] }
  0x31   : > { %1464 = vmatpush3.bf16.msra.mxu1 %v1463_v33  ;;  %482 = vmatprep.mubr.f32.mxu1 %v238_v35  ;;  %v1479_v33 = vpack.c.bf16 %v312_v23, %v311_v22  ;;  %v207_v34 = vld [vmem:[%s1628_s20 + $0x120] sm:$0xff]  ;;  %v262_v35 = vld [vmem:[%s1628_s20 + $0x2d8] sm:$0xff]  ;;  %v193_v63 = vld [vmem:[%s1628_s20 + $0xb0] sm:$0xff] }
  0x32   : > { %1496 = vmatpush3.bf16.msra.mxu0 %v1495_v36  ;;  %1466 = vmatprep.subr.bf16.mxu1 %v1465_v37  ;;  %v1511_v36 = vpack.c.bf16 %v344_v26, %v343_v24  ;;  %v1481_v37 = vpack.c.bf16 %v330_v28, %v329_v27  ;;  %v191_v62 = vld [vmem:[%s1628_s20 + $0xa0] sm:$0xff]  ;;  %v205_v7 = vld [vmem:[%s1628_s20 + $0x110] sm:$0xff]  ;;  %v210_v8 = vld [vmem:[%s1628_s20 + $0x138] sm:$0xff] }
  0x33   : > { %442 = vmatprep.mubr.f32.mxu0 %v190_v45  ;;  %1498 = vmatprep.subr.bf16.mxu0 %v1497_v41  ;;  %v345_v41 = vld [vmem:[%s2066_s1 + $0x270] sm:$0xff]  ;;  %v1483_v45 = vpack.c.bf16 %v314_v39, %v313_v38  ;;  %v203_v6 = vld [vmem:[%s1628_s20 + $0x100] sm:$0xff]  ;;  %v216_v12 = vld [vmem:[%s1628_s20 + $0x168] sm:$0xff] }
  0x34   : > { %483 = vmatmul.mubr.f32.gmra.mrb[6].mxu1 %v237_v48  ;;  %443 = vmatmul.mubr.f32.gmra.mrb[6].mxu0 %v189_v50  ;;  %v1515_v48 = vpack.c.bf16 %v346_v42, %v345_v41  ;;  %v173_v50 = vld [vmem:[%s1628_s20 + $0x10] sm:$0xff]  ;;  %v211_v11 = vld [vmem:[%s1628_s20 + $0x140] sm:$0xff]  ;;  %v234_v24 = vld [vmem:[%s1628_s20 + $0x1f8] sm:$0xff] }
  0x35   : > { %1468 = vmatpush3.bf16.msra.mxu1 %v1467_v49  ;;  %487 = vmatprep.mubr.f32.mxu1 %v244_v51  ;;  %v176_v49 = vld [vmem:[%s1628_s20 + $0x28] sm:$0xff]  ;;  %v175_v51 = vld [vmem:[%s1628_s20 + $0x20] sm:$0xff]  ;;  %v209_v10 = vld [vmem:[%s1628_s20 + $0x130] sm:$0xff] }
  0x36   : > { %1500 = vmatpush3.bf16.msra.mxu0 %v1499_v52  ;;  %1470 = vmatprep.subr.bf16.mxu1 %v1469_v53  ;;  %v180_v52 = vld [vmem:[%s1628_s20 + $0x48] sm:$0xff]  ;;  %v182_v53 = vld [vmem:[%s1628_s20 + $0x58] sm:$0xff]  ;;  %v215_v14 = vld [vmem:[%s1628_s20 + $0x160] sm:$0xff] }
  0x37   : > { %447 = vmatprep.mubr.f32.mxu0 %v196_v61  ;;  %1502 = vmatprep.subr.bf16.mxu0 %v1501_v57  ;;  %v188_v57 = vld [vmem:[%s1628_s20 + $0x88] sm:$0xff]  ;;  %v194_v61 = vld [vmem:[%s1628_s20 + $0xb8] sm:$0xff]  ;;  %v217_v15 = vld [vmem:[%s1628_s20 + $0x170] sm:$0xff] }
  0x38   : > { %488 = vmatmul.mubr.f32.gmra.mrb[8].mxu1 %v243_v0  ;;  %448 = vmatmul.mubr.f32.gmra.mrb[8].mxu0 %v195_v2  ;;  %v198_v0 = vld [vmem:[%s1628_s20 + $0xd8] sm:$0xff]  ;;  %v197_v2 = vld [vmem:[%s1628_s20 + $0xd0] sm:$0xff]  ;;  %v227_v22 = vld [vmem:[%s1628_s20 + $0x1c0] sm:$0xff] }
  0x39   : > { %1472 = vmatpush3.bf16.msra.mxu1 %v1471_v1  ;;  %492 = vmatprep.mubr.f32.mxu1 %v250_v3  ;;  %v200_v1 = vld [vmem:[%s1628_s20 + $0xe8] sm:$0xff]  ;;  %v199_v3 = vld [vmem:[%s1628_s20 + $0xe0] sm:$0xff]  ;;  %v229_v23 = vld [vmem:[%s1628_s20 + $0x1d0] sm:$0xff] }
  0x3a   : > { %1504 = vmatpush3.bf16.msra.mxu0 %v1503_v4  ;;  %1474 = vmatprep.subr.bf16.mxu1 %v1473_v5  ;;  %v204_v4 = vld [vmem:[%s1628_s20 + $0x108] sm:$0xff]  ;;  %v206_v5 = vld [vmem:[%s1628_s20 + $0x118] sm:$0xff]  ;;  %v233_v26 = vld [vmem:[%s1628_s20 + $0x1f0] sm:$0xff] }
  0x3b   : > { %452 = vmatprep.mubr.f32.mxu0 %v202_v13  ;;  %1506 = vmatprep.subr.bf16.mxu0 %v1505_v9  ;;  %v212_v9 = vld [vmem:[%s1628_s20 + $0x148] sm:$0xff]  ;;  %v218_v13 = vld [vmem:[%s1628_s20 + $0x178] sm:$0xff]  ;;  %v235_v27 = vld [vmem:[%s1628_s20 + $0x200] sm:$0xff] }
  0x3c   : > { %493 = vmatmul.mubr.f32.gmra.mrb[10].mxu1 %v249_v16  ;;  %453 = vmatmul.mubr.f32.gmra.mrb[10].mxu0 %v201_v18  ;;  %v222_v16 = vld [vmem:[%s1628_s20 + $0x198] sm:$0xff]  ;;  %v221_v18 = vld [vmem:[%s1628_s20 + $0x190] sm:$0xff]  ;;  %v240_v28 = vld [vmem:[%s1628_s20 + $0x228] sm:$0xff] }
  0x3d   : > { %1476 = vmatpush3.bf16.msra.mxu1 %v1475_v17  ;;  %497 = vmatprep.mubr.f32.mxu1 %v256_v19  ;;  %v224_v17 = vld [vmem:[%s1628_s20 + $0x1a8] sm:$0xff]  ;;  %v223_v19 = vld [vmem:[%s1628_s20 + $0x1a0] sm:$0xff]  ;;  %v241_v31 = vld [vmem:[%s1628_s20 + $0x230] sm:$0xff] }
  0x3e   : > { %1508 = vmatpush3.bf16.msra.mxu0 %v1507_v20  ;;  %1478 = vmatprep.subr.bf16.mxu1 %v1477_v21  ;;  %v228_v20 = vld [vmem:[%s1628_s20 + $0x1c8] sm:$0xff]  ;;  %v230_v21 = vld [vmem:[%s1628_s20 + $0x1d8] sm:$0xff]  ;;  %v239_v30 = vld [vmem:[%s1628_s20 + $0x220] sm:$0xff] }
  0x3f   : > { %457 = vmatprep.mubr.f32.mxu0 %v208_v29  ;;  %1510 = vmatprep.subr.bf16.mxu0 %v1509_v25  ;;  %v236_v25 = vld [vmem:[%s1628_s20 + $0x208] sm:$0xff]  ;;  %v242_v29 = vld [vmem:[%s1628_s20 + $0x238] sm:$0xff]  ;;  %v251_v38 = vld [vmem:[%s1628_s20 + $0x280] sm:$0xff] }
  0x40   : > { %498 = vmatmul.mubr.f32.gmra.mrb[12].mxu1 %v255_v32  ;;  %458 = vmatmul.mubr.f32.gmra.mrb[12].mxu0 %v207_v34  ;;  %v246_v32 = vld [vmem:[%s1628_s20 + $0x258] sm:$0xff]  ;;  %v245_v34 = vld [vmem:[%s1628_s20 + $0x250] sm:$0xff]  ;;  %v260_v41 = vld [vmem:[%s1628_s20 + $0x2c8] sm:$0xff] }
  0x41   : > { %1480 = vmatpush3.bf16.msra.mxu1 %v1479_v33  ;;  %502 = vmatprep.mubr.f32.mxu1 %v262_v35  ;;  %v248_v33 = vld [vmem:[%s1628_s20 + $0x268] sm:$0xff]  ;;  %v247_v35 = vld [vmem:[%s1628_s20 + $0x260] sm:$0xff]  ;;  %v253_v39 = vld [vmem:[%s1628_s20 + $0x290] sm:$0xff] }
  0x42   : > { %1512 = vmatpush3.bf16.msra.mxu0 %v1511_v36  ;;  %1482 = vmatprep.subr.bf16.mxu1 %v1481_v37  ;;  %v252_v36 = vld [vmem:[%s1628_s20 + $0x288] sm:$0xff]  ;;  %v254_v37 = vld [vmem:[%s1628_s20 + $0x298] sm:$0xff]  ;;  %v257_v42 = vld [vmem:[%s1628_s20 + $0x2b0] sm:$0xff] }
  0x43   : > { %462 = vmatprep.mubr.f32.mxu0 %v214_v43  ;;  %1514 = vmatprep.subr.bf16.mxu0 %v1513_v40  ;;  %v258_v40 = vld [vmem:[%s1628_s20 + $0x2b8] sm:$0xff]  ;;  %v259_v43 = vld [vmem:[%s1628_s20 + $0x2c0] sm:$0xff] }
  0x44   : > { %503 = vmatmul.mubr.f32.gmra.mrb[14].mxu1 %v261_v44  ;;  %463 = vmatmul.mubr.f32.gmra.mrb[14].mxu0 %v213_v46  ;;  %v264_v44 = vld [vmem:[%s1628_s20 + $0x2e8] sm:$0xff]  ;;  %v263_v46 = vld [vmem:[%s1628_s20 + $0x2e0] sm:$0xff] }
  0x45   : > { %1484 = vmatpush3.bf16.msra.mxu1 %v1483_v45  ;;  %572 = vmatprep.mubr.f32.mxu1 %v174_v47  ;;  %v266_v45 = vld [vmem:[%s1628_s20 + $0x2f8] sm:$0xff]  ;;  %v265_v47 = vld [vmem:[%s1628_s20 + $0x2f0] sm:$0xff] }
  0x46   : > { %1516 = vmatpush3.bf16.msra.mxu0 %v1515_v48  ;;  %717 = vmatprep.mubr.f32.mxu0 %v176_v49 }
  0x48   : > { %573 = vmatmul.mubr.f32.vlgmr.msra.gmra.mrb[16].mxu1 %v173_v50 }
  0x49   : > { %718 = vmatmul.mubr.f32.vlgmr.msra.gmra.mrb[16].mxu0 %v175_v51  ;;  %577 = vmatprep.mubr.f32.mxu1 %v180_v52 }
  0x4a   : > { %722 = vmatprep.mubr.f32.mxu0 %v182_v53 }
  0x4c   : > { %578 = vmatmul.mubr.f32.gmra.mrb[18].mxu1 %v179_v54 }
  0x4d   : > { %723 = vmatmul.mubr.f32.gmra.mrb[18].mxu0 %v181_v55  ;;  %582 = vmatprep.mubr.f32.mxu1 %v186_v56 }
  0x4e   : > { %727 = vmatprep.mubr.f32.mxu0 %v188_v57 }
  0x50   : > { %583 = vmatmul.mubr.f32.gmra.mrb[20].mxu1 %v185_v58 }
  0x51   : > { %728 = vmatmul.mubr.f32.gmra.mrb[20].mxu0 %v187_v59  ;;  %587 = vmatprep.mubr.f32.mxu1 %v192_v60 }
  0x52   : > { %732 = vmatprep.mubr.f32.mxu0 %v194_v61 }
  0x54   : > { %588 = vmatmul.mubr.f32.gmra.mrb[22].mxu1 %v191_v62 }
  0x55   : > { %733 = vmatmul.mubr.f32.gmra.mrb[22].mxu0 %v193_v63  ;;  %592 = vmatprep.mubr.f32.mxu1 %v198_v0 }
  0x56   : > { %737 = vmatprep.mubr.f32.mxu0 %v200_v1 }
  0x58   : > { %593 = vmatmul.mubr.f32.gmra.mrb[24].mxu1 %v197_v2 }
  0x59   : > { %738 = vmatmul.mubr.f32.gmra.mrb[24].mxu0 %v199_v3  ;;  %597 = vmatprep.mubr.f32.mxu1 %v204_v4 }
  0x5a   : > { %742 = vmatprep.mubr.f32.mxu0 %v206_v5 }
  0x5c   : > { %598 = vmatmul.mubr.f32.gmra.mrb[26].mxu1 %v203_v6 }
  0x5d   : > { %743 = vmatmul.mubr.f32.gmra.mrb[26].mxu0 %v205_v7  ;;  %602 = vmatprep.mubr.f32.mxu1 %v210_v8 }
  0x5e   : > { %747 = vmatprep.mubr.f32.mxu0 %v212_v9 }
  0x60   : > { %603 = vmatmul.mubr.f32.gmra.mrb[28].mxu1 %v209_v10 }
  0x61   : > { %748 = vmatmul.mubr.f32.gmra.mrb[28].mxu0 %v211_v11  ;;  %607 = vmatprep.mubr.f32.mxu1 %v216_v12 }
  0x62   : > { %752 = vmatprep.mubr.f32.mxu0 %v218_v13 }
  0x64   : > { %608 = vmatmul.mubr.f32.gmra.mrb[30].mxu1 %v215_v14 }
  0x65   : > { %753 = vmatmul.mubr.f32.gmra.mrb[30].mxu0 %v217_v15  ;;  %612 = vmatprep.mubr.f32.mxu1 %v222_v16 }
  0x66   : > { %757 = vmatprep.mubr.f32.mxu0 %v224_v17 }
  0x68   : > { %613 = vmatmul.mubr.f32.gmra.mrb[32].mxu1 %v221_v18 }
  0x69   : > { %758 = vmatmul.mubr.f32.gmra.mrb[32].mxu0 %v223_v19  ;;  %617 = vmatprep.mubr.f32.mxu1 %v228_v20 }
  0x6a   : > { %762 = vmatprep.mubr.f32.mxu0 %v230_v21 }
  0x6c   : > { %618 = vmatmul.mubr.f32.gmra.mrb[34].mxu1 %v227_v22 }
  0x6d   : > { %763 = vmatmul.mubr.f32.gmra.mrb[34].mxu0 %v229_v23  ;;  %622 = vmatprep.mubr.f32.mxu1 %v234_v24 }
  0x6e   : > { %767 = vmatprep.mubr.f32.mxu0 %v236_v25 }
  0x70   : > { %623 = vmatmul.mubr.f32.gmra.mrb[36].mxu1 %v233_v26 }
  0x71   : > { %768 = vmatmul.mubr.f32.gmra.mrb[36].mxu0 %v235_v27  ;;  %627 = vmatprep.mubr.f32.mxu1 %v240_v28 }
  0x72   : > { %772 = vmatprep.mubr.f32.mxu0 %v242_v29 }
  0x74   : > { %628 = vmatmul.mubr.f32.gmra.mrb[38].mxu1 %v239_v30 }
  0x75   : > { %773 = vmatmul.mubr.f32.gmra.mrb[38].mxu0 %v241_v31  ;;  %632 = vmatprep.mubr.f32.mxu1 %v246_v32 }
  0x76   : > { %777 = vmatprep.mubr.f32.mxu0 %v248_v33 }
  0x78   : > { %633 = vmatmul.mubr.f32.gmra.mrb[40].mxu1 %v245_v34 }
  0x79   : > { %778 = vmatmul.mubr.f32.gmra.mrb[40].mxu0 %v247_v35  ;;  %637 = vmatprep.mubr.f32.mxu1 %v252_v36 }
  0x7a   : > { %782 = vmatprep.mubr.f32.mxu0 %v254_v37 }
  0x7c   : > { %638 = vmatmul.mubr.f32.gmra.mrb[42].mxu1 %v251_v38 }
  0x7d   : > { %783 = vmatmul.mubr.f32.gmra.mrb[42].mxu0 %v253_v39  ;;  %642 = vmatprep.mubr.f32.mxu1 %v258_v40 }
  0x7e   : > { %787 = vmatprep.mubr.f32.mxu0 %v260_v41 }
  0x80   : > { %643 = vmatmul.mubr.f32.gmra.mrb[44].mxu1 %v257_v42 }
  0x81   : > { %788 = vmatmul.mubr.f32.gmra.mrb[44].mxu0 %v259_v43  ;;  %647 = vmatprep.mubr.f32.mxu1 %v264_v44 }
  0x82   : > { %792 = vmatprep.mubr.f32.mxu0 %v266_v45  ;;  %v2001_v45 = vld [vmem:[%s2067_s2] ss:$0 sm:$0xff] }
  0x84   : > { %648 = vmatmul.mubr.f32.gmra.mrb[46].mxu1 %v263_v46 }
  0x85   : > { %793 = vmatmul.mubr.f32.gmra.mrb[46].mxu0 %v265_v47 }
  0xfb   : > { %v1237_v48 = vpop.f32.mrb[0].mxu1  ;;  %v1213_v49 = vpop.f32.mrb[0].mxu0 }
  0xfc   : > { %v1238_v50 = vpop.f32.mrb[1].mxu1  ;;  %v1214_v51 = vpop.f32.mrb[1].mxu0 }
  0xfd   : > { %v1972_v52 = vadd.f32 %v1238_v50, %v1237_v48  ;;  %v1215_v53 = vadd.f32 %v1214_v51, %v1213_v49 }
  0xff   : > { %v1240_v54 = vpop.f32.mrb[2].mxu1  ;;  %v1216_v55 = vpop.f32.mrb[2].mxu0 }
 0x100   : > { %v1241_v56 = vpop.f32.mrb[3].mxu1  ;;  %v1217_v57 = vpop.f32.mrb[3].mxu0 }
 0x101   : > { %v1974_v58 = vadd.f32 %v1241_v56, %v1240_v54  ;;  %v1218_v59 = vadd.f32 %v1217_v57, %v1216_v55 }
 0x103   : > { %v1243_v60 = vpop.f32.mrb[4].mxu1  ;;  %v1219_v61 = vpop.f32.mrb[4].mxu0 }
 0x104   : > { %v1244_v62 = vpop.f32.mrb[5].mxu1  ;;  %v1220_v63 = vpop.f32.mrb[5].mxu0 }
 0x105   : > { %v1976_v0 = vadd.f32 %v1244_v62, %v1243_v60  ;;  %v1221_v1 = vadd.f32 %v1220_v63, %v1219_v61  ;;  %v1551_v60 = vmov 0.0  }
 0x107   : > { %v1246_v2 = vpop.f32.mrb[6].mxu1  ;;  %v1222_v3 = vpop.f32.mrb[6].mxu0 }
 0x108   : > { %v1247_v4 = vpop.f32.mrb[7].mxu1  ;;  %v1223_v5 = vpop.f32.mrb[7].mxu0 }
 0x109   : > { %v1978_v6 = vadd.f32 %v1247_v4, %v1246_v2  ;;  %v1980_v7 = vadd.f32 %v1223_v5, %v1222_v3 }
 0x10b   : > { %v1249_v8 = vpop.f32.mrb[8].mxu1  ;;  %v1225_v9 = vpop.f32.mrb[8].mxu0 }
 0x10c   : > { %v1250_v10 = vpop.f32.mrb[9].mxu1  ;;  %v1226_v11 = vpop.f32.mrb[9].mxu0 }
 0x10d   : > { %v1982_v12 = vadd.f32 %v1250_v10, %v1249_v8  ;;  %v1984_v13 = vadd.f32 %v1226_v11, %v1225_v9 }
 0x10f   : > { %v1252_v14 = vpop.f32.mrb[10].mxu1  ;;  %v1228_v15 = vpop.f32.mrb[10].mxu0 }
 0x110   : > { %v1253_v16 = vpop.f32.mrb[11].mxu1  ;;  %v1229_v17 = vpop.f32.mrb[11].mxu0 }
 0x111   : > { %v1986_v18 = vadd.f32 %v1253_v16, %v1252_v14  ;;  %v1988_v19 = vadd.f32 %v1229_v17, %v1228_v15 }
 0x113   : > { %v1255_v20 = vpop.f32.mrb[12].mxu1  ;;  %v1231_v21 = vpop.f32.mrb[12].mxu0 }
 0x114   : > { %v1256_v22 = vpop.f32.mrb[13].mxu1  ;;  %v1232_v23 = vpop.f32.mrb[13].mxu0 }
 0x115   : > { %v1990_v24 = vadd.f32 %v1256_v22, %v1255_v20  ;;  %v1992_v25 = vadd.f32 %v1232_v23, %v1231_v21 }
 0x117   : > { %v1258_v26 = vpop.f32.mrb[14].mxu1  ;;  %v1234_v27 = vpop.f32.mrb[14].mxu0 }
 0x118   : > { %v1259_v28 = vpop.f32.mrb[15].mxu1  ;;  %v1235_v29 = vpop.f32.mrb[15].mxu0 }
 0x119   : > { %v1994_v30 = vadd.f32 %v1259_v28, %v1258_v26  ;;  %v1996_v31 = vadd.f32 %v1235_v29, %v1234_v27 }
 0x11b   : > { %v1293_v32 = vpop.f32.mrb[16].mxu1 }
 0x11c   : > { %v1294_v33 = vpop.f32.mrb[17].mxu1  ;;  %v1373_v34 = vpop.f32.mrb[16].mxu0 }
 0x11d   : > { %v1295_v35 = vadd.f32 %v1294_v33, %v1293_v32  ;;  %v1374_v36 = vpop.f32.mrb[17].mxu0 }
 0x11e   : > { %v1375_v37 = vadd.f32 %v1374_v36, %v1373_v34 }
 0x11f   : > { %v575_v38 = vadd.f32 %v1295_v35, %v1215_v53  ;;  %v1296_v39 = vpop.f32.mrb[18].mxu1 }
 0x120   : > { %v1297_v40 = vpop.f32.mrb[19].mxu1  ;;  %v1376_v41 = vpop.f32.mrb[18].mxu0 }
 0x121   : > { %v720_v42 = vadd.f32 %v1375_v37, %v575_v38  ;;  %v1298_v43 = vadd.f32 %v1297_v40, %v1296_v39  ;;  %v1377_v44 = vpop.f32.mrb[19].mxu0 }
 0x122   : > { %v1378_v46 = vadd.f32 %v1377_v44, %v1376_v41 }
 0x123   : > { %v580_v47 = vadd.f32 %v1298_v43, %v1218_v59  ;;  %v1299_v48 = vpop.f32.mrb[20].mxu1  ;;  %vm825_vm0 = vcmp.gt.f32.partialorder %v720_v42, %v2001_v45 }
 0x124   : > { %v1300_v49 = vpop.f32.mrb[21].mxu1  ;;  %v1379_v50 = vpop.f32.mrb[20].mxu0  ;;  %v1085_v61 = vsel %vm825_vm0, 1.0, %v1551_v60 }
 0x125   : > { %v725_v51 = vadd.f32 %v1378_v46, %v580_v47  ;;  %v1301_v53 = vadd.f32 %v1300_v49, %v1299_v48  ;;  %v1380_v54 = vpop.f32.mrb[21].mxu0  ;;  %v831_v15 = vsub.f32 1.0, %v1085_v61 }
 0x126   : > { %v1381_v55 = vadd.f32 %v1380_v54, %v1379_v50 }
 0x127   : > { %vm826_vm1 = vcmp.gt.f32.partialorder %v725_v51, %v2001_v45  ;;  %v585_v56 = vadd.f32 %v1301_v53, %v1221_v1  ;;  %v1302_v57 = vpop.f32.mrb[22].mxu1 }
 0x128   : > { %v1086_v59 = vsel %vm826_vm1, 1.0, %v1551_v60  ;;  %v1303_v62 = vpop.f32.mrb[23].mxu1  ;;  %v1382_v63 = vpop.f32.mrb[22].mxu0 }
 0x129   : > { %v1137_v2 = vpack.c.bf16 %v1086_v59, %v1085_v61  ;;  %v730_v3 = vadd.f32 %v1381_v55, %v585_v56  ;;  %v1304_v4 = vadd.f32 %v1303_v62, %v1302_v57  ;;  %v1383_v5 = vpop.f32.mrb[23].mxu0  ;;  %v832_v32 = vsub.f32 1.0, %v1086_v59 }
 0x12a   : > { %v1384_v8 = vadd.f32 %v1383_v5, %v1382_v63 }
 0x12b   : > { %1138 = vst [vmem:[%s2010_s21] sm:$0xff] %v1137_v2   ;;  %v845_v1 = vadd.f32 %v730_v3, %v720_v42  ;;  %v590_v9 = vadd.f32 %v1304_v4, %v1980_v7  ;;  %v1305_v10 = vpop.f32.mrb[24].mxu1 }
 0x12c   : > { %v1306_v11 = vpop.f32.mrb[25].mxu1  ;;  %v1385_v14 = vpop.f32.mrb[24].mxu0 }
 0x12d   : > { %vm847_vm2 = vcmp.gt.f32.partialorder %v845_v1, %v2001_v45  ;;  %v735_v16 = vadd.f32 %v1384_v8, %v590_v9  ;;  %v1307_v17 = vadd.f32 %v1306_v11, %v1305_v10  ;;  %v1386_v20 = vpop.f32.mrb[25].mxu0 }
 0x12e   : > { %v1089_v21 = vsel %vm847_vm2, 1.0, %v1551_v60  ;;  %v1387_v22 = vadd.f32 %v1386_v20, %v1385_v14 }
 0x12f   : > { %v853_v23 = vmul.f32 %v1089_v21, %v831_v15  ;;  %v855_v26 = vsub.f32 1.0, %v1089_v21  ;;  %v846_v27 = vadd.f32 %v735_v16, %v725_v51  ;;  %v595_v28 = vadd.f32 %v1307_v17, %v1984_v13  ;;  %v1308_v29 = vpop.f32.mrb[26].mxu1 }
 0x130   : > { %v1309_v7 = vpop.f32.mrb[27].mxu1  ;;  %v1388_v33 = vpop.f32.mrb[26].mxu0 }
 0x131   : > { %vm848_vm3 = vcmp.gt.f32.partialorder %v846_v27, %v2001_v45  ;;  %v740_v34 = vadd.f32 %v1387_v22, %v595_v28  ;;  %v857_v35 = vmul.f32 %v855_v26, %v831_v15  ;;  %v1310_v36 = vadd.f32 %v1309_v7, %v1308_v29  ;;  %v1389_v37 = vpop.f32.mrb[27].mxu0 }
 0x132   : > { %v1090_v38 = vsel %vm848_vm3, 1.0, %v1551_v60  ;;  %v1390_v39 = vadd.f32 %v1389_v37, %v1388_v33 }
 0x133   : > { %v854_v40 = vmul.f32 %v1090_v38, %v832_v32  ;;  %v856_v41 = vsub.f32 1.0, %v1090_v38  ;;  %v871_v42 = vadd.f32 %v845_v1, %v740_v34  ;;  %v600_v43 = vadd.f32 %v1310_v36, %v1988_v19  ;;  %v1311_v13 = vpop.f32.mrb[28].mxu1 }
 0x134   : > { %v1312_v44 = vpop.f32.mrb[29].mxu1  ;;  %v1391_v46 = vpop.f32.mrb[28].mxu0 }
 0x135   : > { %v1142_v47 = vpack.c.bf16 %v854_v40, %v853_v23  ;;  %vm873_vm4 = vcmp.gt.f32.partialorder %v871_v42, %v2001_v45  ;;  %v745_v48 = vadd.f32 %v1390_v39, %v600_v43  ;;  %v858_v49 = vmul.f32 %v856_v41, %v832_v32  ;;  %v1392_v50 = vpop.f32.mrb[29].mxu0 }
 0x136   : > { %v1093_v51 = vsel %vm873_vm4, 1.0, %v1551_v60  ;;  %v1313_v53 = vadd.f32 %v1312_v44, %v1311_v13  ;;  %v1393_v54 = vadd.f32 %v1392_v50, %v1391_v46 }
 0x137   : > { %1174 = vst [vmem:[%s2010_s21 + $0x8] sm:$0xff] %v1142_v47   ;;  %v879_v55 = vmul.f32 %v1093_v51, %v857_v35  ;;  %v881_v56 = vsub.f32 1.0, %v1093_v51  ;;  %v872_v57 = vadd.f32 %v846_v27, %v745_v48  ;;  %v1314_v61 = vpop.f32.mrb[30].mxu1 }
 0x138   : > { %v605_v19 = vadd.f32 %v1313_v53, %v1992_v25  ;;  %v1315_v59 = vpop.f32.mrb[31].mxu1  ;;  %v1394_v62 = vpop.f32.mrb[30].mxu0 }
 0x139   : > { %vm874_vm5 = vcmp.gt.f32.partialorder %v872_v57, %v2001_v45  ;;  %v883_v63 = vmul.f32 %v881_v56, %v857_v35  ;;  %v1316_v2 = vadd.f32 %v1315_v59, %v1314_v61  ;;  %v1395_v3 = vpop.f32.mrb[31].mxu0 }
 0x13a   : > { %v1094_v4 = vsel %vm874_vm5, 1.0, %v1551_v60  ;;  %v750_v5 = vadd.f32 %v1393_v54, %v605_v19  ;;  %v1396_v8 = vadd.f32 %v1395_v3, %v1394_v62 }
 0x13b   : > { %v880_v1 = vmul.f32 %v1094_v4, %v858_v49  ;;  %v882_v9 = vsub.f32 1.0, %v1094_v4  ;;  %v610_v10 = vadd.f32 %v1316_v2, %v1996_v31  ;;  %v1317_v11 = vpop.f32.mrb[32].mxu1 }
 0x13c   : > { %v897_v14 = vadd.f32 %v871_v42, %v750_v5  ;;  %v1318_v15 = vpop.f32.mrb[33].mxu1  ;;  %v1397_v25 = vpop.f32.mrb[32].mxu0 }
 0x13d   : > { %v1147_v16 = vpack.c.bf16 %v880_v1, %v879_v55  ;;  %v755_v17 = vadd.f32 %v1396_v8, %v610_v10  ;;  %v884_v20 = vmul.f32 %v882_v9, %v858_v49  ;;  %v1319_v21 = vadd.f32 %v1318_v15, %v1317_v11  ;;  %v1398_v22 = vpop.f32.mrb[33].mxu0 }
 0x13e   : > { %vm899_vm6 = vcmp.gt.f32.partialorder %v897_v14, %v2001_v45  ;;  %v1399_v23 = vadd.f32 %v1398_v22, %v1397_v25 }
 0x13f   : > { %1175 = vst [vmem:[%s2010_s21 + $0x10] sm:$0xff] %v1147_v16   ;;  %v1097_v26 = vsel %vm899_vm6, 1.0, %v1551_v60  ;;  %v898_v27 = vadd.f32 %v872_v57, %v755_v17  ;;  %v615_v28 = vadd.f32 %v1319_v21, %v1972_v52  ;;  %v1320_v29 = vpop.f32.mrb[34].mxu1 }
 0x140   : > { %v905_v31 = vmul.f32 %v1097_v26, %v883_v63  ;;  %v907_v32 = vsub.f32 1.0, %v1097_v26  ;;  %v1321_v7 = vpop.f32.mrb[35].mxu1  ;;  %v1400_v33 = vpop.f32.mrb[34].mxu0 }
 0x141   : > { %vm900_vm7 = vcmp.gt.f32.partialorder %v898_v27, %v2001_v45  ;;  %v760_v34 = vadd.f32 %v1399_v23, %v615_v28  ;;  %v1322_v35 = vadd.f32 %v1321_v7, %v1320_v29  ;;  %v1401_v36 = vpop.f32.mrb[35].mxu0 }
 0x142   : > { %v1098_v37 = vsel %vm900_vm7, 1.0, %v1551_v60  ;;  %v909_v38 = vmul.f32 %v907_v32, %v883_v63  ;;  %v1402_v39 = vadd.f32 %v1401_v36, %v1400_v33 }
 0x143   : > { %v906_v40 = vmul.f32 %v1098_v37, %v884_v20  ;;  %v908_v41 = vsub.f32 1.0, %v1098_v37  ;;  %v923_v42 = vadd.f32 %v897_v14, %v760_v34  ;;  %v620_v52 = vadd.f32 %v1322_v35, %v1974_v58  ;;  %v1323_v43 = vpop.f32.mrb[36].mxu1 }
 0x144   : > { %v1324_v13 = vpop.f32.mrb[37].mxu1  ;;  %v1403_v44 = vpop.f32.mrb[36].mxu0 }
 0x145   : > { %v1152_v46 = vpack.c.bf16 %v906_v40, %v905_v31  ;;  %vm925_vm8 = vcmp.gt.f32.partialorder %v923_v42, %v2001_v45  ;;  %v765_v47 = vadd.f32 %v1402_v39, %v620_v52  ;;  %v910_v48 = vmul.f32 %v908_v41, %v884_v20  ;;  %v1404_v49 = vpop.f32.mrb[37].mxu0 }
 0x146   : > { %v1101_v50 = vsel %vm925_vm8, 1.0, %v1551_v60  ;;  %v1325_v51 = vadd.f32 %v1324_v13, %v1323_v43  ;;  %v1405_v53 = vadd.f32 %v1404_v49, %v1403_v44 }
 0x147   : > { %1176 = vst [vmem:[%s2010_s21 + $0x18] sm:$0xff] %v1152_v46   ;;  %v931_v54 = vmul.f32 %v1101_v50, %v909_v38  ;;  %v933_v55 = vsub.f32 1.0, %v1101_v50  ;;  %v924_v56 = vadd.f32 %v898_v27, %v765_v47  ;;  %v1326_v57 = vpop.f32.mrb[38].mxu1 }
 0x148   : > { %v625_v58 = vadd.f32 %v1325_v51, %v1976_v0  ;;  %v1327_v61 = vpop.f32.mrb[39].mxu1  ;;  %v1406_v19 = vpop.f32.mrb[38].mxu0 }
 0x149   : > { %vm926_vm9 = vcmp.gt.f32.partialorder %v924_v56, %v2001_v45  ;;  %v935_v59 = vmul.f32 %v933_v55, %v909_v38  ;;  %v1328_v62 = vadd.f32 %v1327_v61, %v1326_v57  ;;  %v1407_v63 = vpop.f32.mrb[39].mxu0 }
 0x14a   : > { %v1102_v2 = vsel %vm926_vm9, 1.0, %v1551_v60  ;;  %v770_v3 = vadd.f32 %v1405_v53, %v625_v58  ;;  %v1408_v4 = vadd.f32 %v1407_v63, %v1406_v19 }
 0x14b   : > { %v932_v5 = vmul.f32 %v1102_v2, %v910_v48  ;;  %v934_v8 = vsub.f32 1.0, %v1102_v2  ;;  %v630_v1 = vadd.f32 %v1328_v62, %v1978_v6  ;;  %v1329_v9 = vpop.f32.mrb[40].mxu1 }
 0x14c   : > { %v949_v10 = vadd.f32 %v923_v42, %v770_v3  ;;  %v1330_v11 = vpop.f32.mrb[41].mxu1  ;;  %v1409_v0 = vpop.f32.mrb[40].mxu0 }
 0x14d   : > { %v1157_v14 = vpack.c.bf16 %v932_v5, %v931_v54  ;;  %v775_v15 = vadd.f32 %v1408_v4, %v630_v1  ;;  %v936_v25 = vmul.f32 %v934_v8, %v910_v48  ;;  %v1331_v16 = vadd.f32 %v1330_v11, %v1329_v9  ;;  %v1410_v17 = vpop.f32.mrb[41].mxu0 }
 0x14e   : > { %vm951_vm10 = vcmp.gt.f32.partialorder %v949_v10, %v2001_v45  ;;  %v1411_v20 = vadd.f32 %v1410_v17, %v1409_v0 }
 0x14f   : > { %1177 = vst [vmem:[%s2010_s21 + $0x20] sm:$0xff] %v1157_v14   ;;  %v1105_v21 = vsel %vm951_vm10, 1.0, %v1551_v60  ;;  %v950_v22 = vadd.f32 %v924_v56, %v775_v15  ;;  %v635_v23 = vadd.f32 %v1331_v16, %v1982_v12  ;;  %v1332_v26 = vpop.f32.mrb[42].mxu1 }
 0x150   : > { %v957_v6 = vmul.f32 %v1105_v21, %v935_v59  ;;  %v959_v27 = vsub.f32 1.0, %v1105_v21  ;;  %v1333_v28 = vpop.f32.mrb[43].mxu1  ;;  %v1412_v29 = vpop.f32.mrb[42].mxu0 }
 0x151   : > { %vm952_vm11 = vcmp.gt.f32.partialorder %v950_v22, %v2001_v45  ;;  %v780_v31 = vadd.f32 %v1411_v20, %v635_v23  ;;  %v1334_v32 = vadd.f32 %v1333_v28, %v1332_v26  ;;  %v1413_v7 = vpop.f32.mrb[43].mxu0 }
 0x152   : > { %v1106_v33 = vsel %vm952_vm11, 1.0, %v1551_v60  ;;  %v961_v34 = vmul.f32 %v959_v27, %v935_v59  ;;  %v1414_v35 = vadd.f32 %v1413_v7, %v1412_v29 }
 0x153   : > { %v958_v36 = vmul.f32 %v1106_v33, %v936_v25  ;;  %v960_v37 = vsub.f32 1.0, %v1106_v33  ;;  %v975_v38 = vadd.f32 %v949_v10, %v780_v31  ;;  %v640_v12 = vadd.f32 %v1334_v32, %v1986_v18  ;;  %v1335_v39 = vpop.f32.mrb[44].mxu1 }
 0x154   : > { %v1336_v40 = vpop.f32.mrb[45].mxu1  ;;  %v1415_v41 = vpop.f32.mrb[44].mxu0 }
 0x155   : > { %v1162_v42 = vpack.c.bf16 %v958_v36, %v957_v6  ;;  %vm977_vm12 = vcmp.gt.f32.partialorder %v975_v38, %v2001_v45  ;;  %v785_v52 = vadd.f32 %v1414_v35, %v640_v12  ;;  %v962_v43 = vmul.f32 %v960_v37, %v936_v25  ;;  %v1416_v13 = vpop.f32.mrb[45].mxu0 }
 0x156   : > { %v1109_v44 = vsel %vm977_vm12, 1.0, %v1551_v60  ;;  %v1337_v46 = vadd.f32 %v1336_v40, %v1335_v39  ;;  %v1417_v47 = vadd.f32 %v1416_v13, %v1415_v41 }
 0x157   : > { %1178 = vst [vmem:[%s2010_s21 + $0x28] sm:$0xff] %v1162_v42   ;;  %v983_v48 = vmul.f32 %v1109_v44, %v961_v34  ;;  %v985_v49 = vsub.f32 1.0, %v1109_v44  ;;  %v976_v50 = vadd.f32 %v950_v22, %v785_v52  ;;  %v1338_v51 = vpop.f32.mrb[46].mxu1 }
 0x158   : > { %v645_v18 = vadd.f32 %v1337_v46, %v1990_v24  ;;  %v1339_v53 = vpop.f32.mrb[47].mxu1  ;;  %v1418_v54 = vpop.f32.mrb[46].mxu0 }
 0x159   : > { %vm978_vm13 = vcmp.gt.f32.partialorder %v976_v50, %v2001_v45  ;;  %v987_v55 = vmul.f32 %v985_v49, %v961_v34  ;;  %v1340_v56 = vadd.f32 %v1339_v53, %v1338_v51  ;;  %v1419_v57 = vpop.f32.mrb[47].mxu0 }
 0x15a   : > { %v1110_v58 = vsel %vm978_vm13, 1.0, %v1551_v60  ;;  %v790_v61 = vadd.f32 %v1417_v47, %v645_v18  ;;  %v1420_v19 = vadd.f32 %v1419_v57, %v1418_v54 }
 0x15b   : > { %v984_v59 = vmul.f32 %v1110_v58, %v962_v43  ;;  %v986_v62 = vsub.f32 1.0, %v1110_v58  ;;  %v650_v63 = vadd.f32 %v1340_v56, %v1994_v30 }
 0x15c   : > { %v1001_v2 = vadd.f32 %v975_v38, %v790_v61 }
 0x15d   : > { %v1167_v3 = vpack.c.bf16 %v984_v59, %v983_v48  ;;  %v795_v24 = vadd.f32 %v1420_v19, %v650_v63  ;;  %v988_v4 = vmul.f32 %v986_v62, %v962_v43 }
 0x15e   : > { %vm1003_vm14 = vcmp.gt.f32.partialorder %v1001_v2, %v2001_v45 }
 0x15f   : > { %1179 = vst [vmem:[%s2010_s21 + $0x30] sm:$0xff] %v1167_v3   ;;  %v1113_v5 = vsel %vm1003_vm14, 1.0, %v1551_v60  ;;  %v1002_v8 = vadd.f32 %v976_v50, %v795_v24 }
 0x160   : > { %v1009_v1 = vmul.f32 %v1113_v5, %v987_v55 }
 0x161   : > { %vm1004_vm15 = vcmp.gt.f32.partialorder %v1002_v8, %v2001_v45 }
 0x162   : > { %v1114_v9 = vsel %vm1004_vm15, 1.0, %v1551_v60 }
 0x163   : > { %v1010_v10 = vmul.f32 %v1114_v9, %v988_v4 }
 0x165   : > { %v1172_v11 = vpack.c.bf16 %v1010_v10, %v1009_v1 }
 0x167   : > { %1180 = vst [vmem:[%s2010_s21 + $0x38] sm:$0xff] %v1172_v11  }
 0x168 PF: > { %s13_s12 = sadd.s32 1, %s1549_s12  }
 0x169   : > { %p10_p4 = scmp.ge.s32.totalorder %s13_s12, 4  }
 0x16b   :  { %12 = sbr.rel (!%p10_p4) target bundleno = 1 (0x1), region = 62 }

</bundles_post_ra>
